<compile_context>
chip_gen: v5e
topology: v5e:2x2
jax: 0.10.0
libtpu: 0.0.40
codegen_flags: <defaults>
</compile_context>

<pallas_src>
import math
import jax
import jax.numpy as jnp
from jax import lax
from jax.experimental import pallas as pl
from jax.experimental.pallas import tpu as pltpu

LANE = 128  # lane-dense padding width for the classifier output


def _layernorm(x, g, b, eps=1e-12):
    mu = jnp.mean(x, axis=-1, keepdims=True)
    var = jnp.mean((x - mu) ** 2, axis=-1, keepdims=True)
    return (x - mu) * lax.rsqrt(var + eps) * g + b


def _gelu(x):
    # tanh-approximate GELU (tanh goes to the EUP slot)
    c = math.sqrt(2.0 / math.pi)
    return 0.5 * x * (1.0 + jnp.tanh(c * (x + 0.044715 * x * x * x)))


# ----------------------------------------------------------------------------
# Single fused kernel: synthetic BERT encoder layer + CLS classifier head.
# No grid: whole problem fits VMEM; batch is a tiny static-unrolled loop.
# ----------------------------------------------------------------------------
def fused_bert_classifier_kernel(
        emb_ref, mask_ref,
        wq_ref, bq_ref, wk_ref, bk_ref, wv_ref, bv_ref,
        wo_ref, bo_ref, ln1_g_ref, ln1_b_ref,
        w1_ref, b1_ref, w2_ref, b2_ref, ln2_g_ref, ln2_b_ref,
        cw1_ref, cb1_ref, cw2_ref, cb2_ref,
        out_ref):
    B, S, H = emb_ref.shape
    scale = 1.0 / math.sqrt(float(H))
    bf16 = jnp.bfloat16
    f32 = jnp.float32

    # Weights are already bf16; load once (single-buffered VMEM residents).
    wq, wk, wv, wo = wq_ref[...], wk_ref[...], wv_ref[...], wo_ref[...]
    w1, w2 = w1_ref[...], w2_ref[...]
    cw1, cw2 = cw1_ref[...], cw2_ref[...]

    for b in range(B):  # B is tiny & static -> fully unrolled, no step overhead
        x = emb_ref[b]          # [S, H] f32
        mask = mask_ref[b]      # [1, S] f32  (1.0 = keep, 0.0 = pad)
        xb = x.astype(bf16)

        # --- self-attention (single head, synthetic encoder) ---
        q = jnp.dot(xb, wq, preferred_element_type=f32) + bq_ref[...]
        k = jnp.dot(xb, wk, preferred_element_type=f32) + bk_ref[...]
        v = jnp.dot(xb, wv, preferred_element_type=f32) + bv_ref[...]

        # Contract last dims of q and k -> no materialized K transpose.
        scores = lax.dot_general(
            q.astype(bf16), k.astype(bf16),
            (((1,), (1,)), ((), ())),
            preferred_element_type=f32) * scale                    # [S, S]
        # Additive key mask, kept in f32 (bf16 cannot hold -1e9 safely).
        scores = jnp.where(mask > 0.0, scores, jnp.float32(-1e9))
        scores = scores - jnp.max(scores, axis=-1, keepdims=True)
        p = jnp.exp(scores)
        p = p * pl.reciprocal(jnp.sum(p, axis=-1, keepdims=True), approx=True)

        ctx = jnp.dot(p.astype(bf16), v.astype(bf16),
                      preferred_element_type=f32)                  # [S, H]
        attn = jnp.dot(ctx.astype(bf16), wo,
                       preferred_element_type=f32) + bo_ref[...]
        h1 = _layernorm(x + attn, ln1_g_ref[...], ln1_b_ref[...])

        # --- feed-forward ---
        ff = _gelu(jnp.dot(h1.astype(bf16), w1,
                           preferred_element_type=f32) + b1_ref[...])
        ff = jnp.dot(ff.astype(bf16), w2,
                     preferred_element_type=f32) + b2_ref[...]
        h2 = _layernorm(h1 + ff, ln2_g_ref[...], ln2_b_ref[...])   # [S, H]

        # --- fused classifier head on the CLS token (row 0) ---
        cls = h2[0:1, :]                                           # [1, H]
        z = jnp.tanh(jnp.dot(cls.astype(bf16), cw1,
                             preferred_element_type=f32) + cb1_ref[...])
        # Dropout: identity in eval mode (no RNG applied).
        logits = jnp.dot(z.astype(bf16), cw2,
                         preferred_element_type=f32) + cb2_ref[...]  # [1, LANE]
        out_ref[b:b + 1, :] = logits.astype(out_ref.dtype)


PARAM_ORDER = [
    "wq", "bq", "wk", "bk", "wv", "bv", "wo", "bo",
    "ln1_g", "ln1_b", "w_ff1", "b_ff1", "w_ff2", "b_ff2",
    "ln2_g", "ln2_b", "c_w1", "c_b1", "c_w2", "c_b2",
]


def run_fused_bert_classifier(emb, mask3, params):
    B = emb.shape[0]
    logits_pad = pl.pallas_call(
        fused_bert_classifier_kernel,
        out_shape=jax.ShapeDtypeStruct((B, LANE), jnp.float32),
        compiler_params=pltpu.CompilerParams(vmem_limit_bytes=32 * 1024 * 1024),
    )(emb, mask3, *[params[n] for n in PARAM_ORDER])
    # Lane-dense store in-kernel; only column 0 carries the logit.
    return logits_pad[:, :1]


# ----------------------------------------------------------------------------
# Parameter init (deterministic, BERT-style 0.02 std) and full forward
# ----------------------------------------------------------------------------
def init_params(key, vocab, max_seq, H, FF):
    f32, bf16 = jnp.float32, jnp.bfloat16

    def nrm(k, shape, dtype=f32):
        return (0.02 * jax.random.normal(k, shape, dtype=f32)).astype(dtype)

    ks = jax.random.split(key, 16)
    c_w2 = nrm(ks[9], (H, 1))                       # Linear(H, 1)
    c_w2_pad = jnp.pad(c_w2, ((0, 0), (0, LANE - 1))).astype(bf16)  # lane-dense

    params = {
        "word_emb": nrm(ks[0], (vocab, H)),
        "pos_emb": nrm(ks[1], (max_seq, H)),
        # matmul weights in bf16 (MXU operands), biases / LN params in f32
        "wq": nrm(ks[2], (H, H), bf16), "bq": jnp.zeros((1, H), f32),
        "wk": nrm(ks[3], (H, H), bf16), "bk": jnp.zeros((1, H), f32),
        "wv": nrm(ks[4], (H, H), bf16), "bv": jnp.zeros((1, H), f32),
        "wo": nrm(ks[5], (H, H), bf16), "bo": jnp.zeros((1, H), f32),
        "ln1_g": jnp.ones((1, H), f32), "ln1_b": jnp.zeros((1, H), f32),
        "w_ff1": nrm(ks[6], (H, FF), bf16), "b_ff1": jnp.zeros((1, FF), f32),
        "w_ff2": nrm(ks[7], (FF, H), bf16), "b_ff2": jnp.zeros((1, H), f32),
        "ln2_g": jnp.ones((1, H), f32), "ln2_b": jnp.zeros((1, H), f32),
        # classifier head: Linear(H, H), Linear(H, 1) padded to LANE columns
        "c_w1": nrm(ks[8], (H, H), bf16), "c_b1": jnp.zeros((1, H), f32),
        "c_w2": c_w2_pad, "c_b2": jnp.zeros((1, LANE), f32),
    }
    return params


def bert_simple_classifier_forward(input_ids, attention_mask, params):
    """Mirrors BertSimpleClassifier.forward(inputs, attention_mask)."""
    B, S = input_ids.shape
    # Embedding lookup (glue, plain JAX): word + position embeddings.
    emb = (params["word_emb"][input_ids]
           + params["pos_emb"][None, :S, :]).astype(jnp.float32)
    mask3 = attention_mask.astype(jnp.float32).reshape(B, 1, S)
    return run_fused_bert_classifier(emb, mask3, params)   # [B, 1]


if __name__ == "__main__":
    B, S, H, FF, VOCAB = 2, 8, 32, 128, 50

    key = jax.random.PRNGKey(0)
    k_ids, k_par = jax.random.split(key)

    input_ids = jax.random.randint(k_ids, (B, S), 0, VOCAB, dtype=jnp.int32)
    # second example has 3 padded positions to exercise the attention mask
    attention_mask = jnp.array(
        [[1, 1, 1, 1, 1, 1, 1, 1],
         [1, 1, 1, 1, 1, 0, 0, 0]], dtype=jnp.float32)

    params = init_params(k_par, VOCAB, S, H, FF)

    proba = bert_simple_classifier_forward(input_ids, attention_mask, params)
    proba = jax.block_until_ready(proba)

    assert proba.shape == (B, 1) and proba.dtype == jnp.float32
    assert bool(jnp.all(jnp.isfinite(proba)))
    print("KERNEL_OK")
</pallas_src>

<mosaic_0001>
module attributes {stable_mosaic.version = 11 : i64} {
  func.func @fused_bert_classifier_kernel(%arg0: memref<2x8x32xf32, #tpu.memory_space<vmem>>, %arg1: memref<2x1x8xf32, #tpu.memory_space<vmem>>, %arg2: memref<32x32xbf16, #tpu.memory_space<vmem>>, %arg3: memref<1x32xf32, #tpu.memory_space<vmem>>, %arg4: memref<32x32xbf16, #tpu.memory_space<vmem>>, %arg5: memref<1x32xf32, #tpu.memory_space<vmem>>, %arg6: memref<32x32xbf16, #tpu.memory_space<vmem>>, %arg7: memref<1x32xf32, #tpu.memory_space<vmem>>, %arg8: memref<32x32xbf16, #tpu.memory_space<vmem>>, %arg9: memref<1x32xf32, #tpu.memory_space<vmem>>, %arg10: memref<1x32xf32, #tpu.memory_space<vmem>>, %arg11: memref<1x32xf32, #tpu.memory_space<vmem>>, %arg12: memref<32x128xbf16, #tpu.memory_space<vmem>>, %arg13: memref<1x128xf32, #tpu.memory_space<vmem>>, %arg14: memref<128x32xbf16, #tpu.memory_space<vmem>>, %arg15: memref<1x32xf32, #tpu.memory_space<vmem>>, %arg16: memref<1x32xf32, #tpu.memory_space<vmem>>, %arg17: memref<1x32xf32, #tpu.memory_space<vmem>>, %arg18: memref<32x32xbf16, #tpu.memory_space<vmem>>, %arg19: memref<1x32xf32, #tpu.memory_space<vmem>>, %arg20: memref<32x128xbf16, #tpu.memory_space<vmem>>, %arg21: memref<1x128xf32, #tpu.memory_space<vmem>>, %arg22: memref<2x128xf32, #tpu.memory_space<vmem>>) attributes {dimension_semantics = [], scalar_prefetch = 0 : i64, scratch_operands = 0 : i64, tpu.core_type = #tpu.core_type<tc>} {
    %c0 = arith.constant 0 : index
    %c0_0 = arith.constant 0 : index
    %0 = vector.load %arg2[%c0, %c0_0] : memref<32x32xbf16, #tpu.memory_space<vmem>>, vector<32x32xbf16>
    %c0_1 = arith.constant 0 : index
    %c0_2 = arith.constant 0 : index
    %1 = vector.load %arg4[%c0_1, %c0_2] : memref<32x32xbf16, #tpu.memory_space<vmem>>, vector<32x32xbf16>
    %c0_3 = arith.constant 0 : index
    %c0_4 = arith.constant 0 : index
    %2 = vector.load %arg6[%c0_3, %c0_4] : memref<32x32xbf16, #tpu.memory_space<vmem>>, vector<32x32xbf16>
    %c0_5 = arith.constant 0 : index
    %c0_6 = arith.constant 0 : index
    %3 = vector.load %arg8[%c0_5, %c0_6] : memref<32x32xbf16, #tpu.memory_space<vmem>>, vector<32x32xbf16>
    %c0_7 = arith.constant 0 : index
    %c0_8 = arith.constant 0 : index
    %4 = vector.load %arg12[%c0_7, %c0_8] : memref<32x128xbf16, #tpu.memory_space<vmem>>, vector<32x128xbf16>
    %c0_9 = arith.constant 0 : index
    %c0_10 = arith.constant 0 : index
    %5 = vector.load %arg14[%c0_9, %c0_10] : memref<128x32xbf16, #tpu.memory_space<vmem>>, vector<128x32xbf16>
    %c0_11 = arith.constant 0 : index
    %c0_12 = arith.constant 0 : index
    %6 = vector.load %arg18[%c0_11, %c0_12] : memref<32x32xbf16, #tpu.memory_space<vmem>>, vector<32x32xbf16>
    %c0_13 = arith.constant 0 : index
    %c0_14 = arith.constant 0 : index
    %7 = vector.load %arg20[%c0_13, %c0_14] : memref<32x128xbf16, #tpu.memory_space<vmem>>, vector<32x128xbf16>
    %c0_15 = arith.constant 0 : index
    %c0_16 = arith.constant 0 : index
    %c0_17 = arith.constant 0 : index
    %8 = vector.load %arg0[%c0_15, %c0_16, %c0_17] : memref<2x8x32xf32, #tpu.memory_space<vmem>>, vector<1x8x32xf32>
    %9 = vector.shape_cast %8 : vector<1x8x32xf32> to vector<8x32xf32>
    %c0_18 = arith.constant 0 : index
    %c0_19 = arith.constant 0 : index
    %c0_20 = arith.constant 0 : index
    %10 = vector.load %arg1[%c0_18, %c0_19, %c0_20] : memref<2x1x8xf32, #tpu.memory_space<vmem>>, vector<1x1x8xf32>
    %11 = vector.shape_cast %10 : vector<1x1x8xf32> to vector<1x8xf32>
    %12 = arith.truncf %9 : vector<8x32xf32> to vector<8x32xbf16>
    %cst = arith.constant dense<0.000000e+00> : vector<8x32xf32>
    %13 = tpu.matmul %12, %0, %cst {dimension_numbers = #tpu.dot_dimension_numbers<[1], [0], [0], [1], [0, 0, 1, 1], [], []>} : vector<8x32xbf16>, vector<32x32xbf16>, vector<8x32xf32> -> vector<8x32xf32>
    %c0_21 = arith.constant 0 : index
    %c0_22 = arith.constant 0 : index
    %14 = vector.load %arg3[%c0_21, %c0_22] : memref<1x32xf32, #tpu.memory_space<vmem>>, vector<1x32xf32>
    %15 = vector.broadcast %14 : vector<1x32xf32> to vector<8x32xf32>
    %16 = arith.addf %13, %15 : vector<8x32xf32>
    %cst_23 = arith.constant dense<0.000000e+00> : vector<8x32xf32>
    %17 = tpu.matmul %12, %1, %cst_23 {dimension_numbers = #tpu.dot_dimension_numbers<[1], [0], [0], [1], [0, 0, 1, 1], [], []>} : vector<8x32xbf16>, vector<32x32xbf16>, vector<8x32xf32> -> vector<8x32xf32>
    %c0_24 = arith.constant 0 : index
    %c0_25 = arith.constant 0 : index
    %18 = vector.load %arg5[%c0_24, %c0_25] : memref<1x32xf32, #tpu.memory_space<vmem>>, vector<1x32xf32>
    %19 = vector.broadcast %18 : vector<1x32xf32> to vector<8x32xf32>
    %20 = arith.addf %17, %19 : vector<8x32xf32>
    %cst_26 = arith.constant dense<0.000000e+00> : vector<8x32xf32>
    %21 = tpu.matmul %12, %2, %cst_26 {dimension_numbers = #tpu.dot_dimension_numbers<[1], [0], [0], [1], [0, 0, 1, 1], [], []>} : vector<8x32xbf16>, vector<32x32xbf16>, vector<8x32xf32> -> vector<8x32xf32>
    %c0_27 = arith.constant 0 : index
    %c0_28 = arith.constant 0 : index
    %22 = vector.load %arg7[%c0_27, %c0_28] : memref<1x32xf32, #tpu.memory_space<vmem>>, vector<1x32xf32>
    %23 = vector.broadcast %22 : vector<1x32xf32> to vector<8x32xf32>
    %24 = arith.addf %21, %23 : vector<8x32xf32>
    %25 = arith.truncf %16 : vector<8x32xf32> to vector<8x32xbf16>
    %26 = arith.truncf %20 : vector<8x32xf32> to vector<8x32xbf16>
    %cst_29 = arith.constant dense<0.000000e+00> : vector<8x8xf32>
    %27 = tpu.matmul %25, %26, %cst_29 {dimension_numbers = #tpu.dot_dimension_numbers<[1], [1], [0], [0], [0, 0, 1, 0], [], []>} : vector<8x32xbf16>, vector<8x32xbf16>, vector<8x8xf32> -> vector<8x8xf32>
    %cst_30 = arith.constant 0.176776692 : f32
    %28 = vector.broadcast %cst_30 : f32 to vector<8x8xf32>
    %29 = arith.mulf %27, %28 : vector<8x8xf32>
    %cst_31 = arith.constant 0.000000e+00 : f32
    %30 = vector.broadcast %cst_31 : f32 to vector<1x8xf32>
    %31 = arith.cmpf ogt, %11, %30 : vector<1x8xf32>
    %cst_32 = arith.constant -1.000000e+09 : f32
    %32 = vector.shape_cast %31 : vector<1x8xi1> to vector<1x8xi1>
    %33 = vector.broadcast %32 : vector<1x8xi1> to vector<8x8xi1>
    %34 = vector.broadcast %cst_32 : f32 to vector<8x8xf32>
    %35 = arith.select %33, %29, %34 : vector<8x8xi1>, vector<8x8xf32>
    %cst_33 = arith.constant dense<0xFF800000> : vector<8xf32>
    %36 = vector.multi_reduction <maximumf>, %35, %cst_33 [1] : vector<8x8xf32> to vector<8xf32>
    %37 = vector.shape_cast %36 : vector<8xf32> to vector<8x1xf32>
    %38 = vector.broadcast %37 : vector<8x1xf32> to vector<8x8xf32>
    %39 = arith.subf %35, %38 : vector<8x8xf32>
    %40 = math.exp %39 : vector<8x8xf32>
    %cst_34 = arith.constant dense<0.000000e+00> : vector<8xf32>
    %41 = vector.multi_reduction <add>, %40, %cst_34 [1] : vector<8x8xf32> to vector<8xf32>
    %42 = vector.shape_cast %41 : vector<8xf32> to vector<8x1xf32>
    %43 = tpu.reciprocal %42 {approx = true} : vector<8x1xf32> -> vector<8x1xf32>
    %44 = vector.broadcast %43 : vector<8x1xf32> to vector<8x8xf32>
    %45 = arith.mulf %40, %44 : vector<8x8xf32>
    %46 = arith.truncf %45 : vector<8x8xf32> to vector<8x8xbf16>
    %47 = arith.truncf %24 : vector<8x32xf32> to vector<8x32xbf16>
    %cst_35 = arith.constant dense<0.000000e+00> : vector<8x32xf32>
    %48 = tpu.matmul %46, %47, %cst_35 {dimension_numbers = #tpu.dot_dimension_numbers<[1], [0], [0], [1], [0, 0, 1, 1], [], []>} : vector<8x8xbf16>, vector<8x32xbf16>, vector<8x32xf32> -> vector<8x32xf32>
    %49 = arith.truncf %48 : vector<8x32xf32> to vector<8x32xbf16>
    %cst_36 = arith.constant dense<0.000000e+00> : vector<8x32xf32>
    %50 = tpu.matmul %49, %3, %cst_36 {dimension_numbers = #tpu.dot_dimension_numbers<[1], [0], [0], [1], [0, 0, 1, 1], [], []>} : vector<8x32xbf16>, vector<32x32xbf16>, vector<8x32xf32> -> vector<8x32xf32>
    %c0_37 = arith.constant 0 : index
    %c0_38 = arith.constant 0 : index
    %51 = vector.load %arg9[%c0_37, %c0_38] : memref<1x32xf32, #tpu.memory_space<vmem>>, vector<1x32xf32>
    %52 = vector.broadcast %51 : vector<1x32xf32> to vector<8x32xf32>
    %53 = arith.addf %50, %52 : vector<8x32xf32>
    %54 = arith.addf %9, %53 : vector<8x32xf32>
    %c0_39 = arith.constant 0 : index
    %c0_40 = arith.constant 0 : index
    %55 = vector.load %arg10[%c0_39, %c0_40] : memref<1x32xf32, #tpu.memory_space<vmem>>, vector<1x32xf32>
    %c0_41 = arith.constant 0 : index
    %c0_42 = arith.constant 0 : index
    %56 = vector.load %arg11[%c0_41, %c0_42] : memref<1x32xf32, #tpu.memory_space<vmem>>, vector<1x32xf32>
    %cst_43 = arith.constant dense<0.000000e+00> : vector<8xf32>
    %57 = vector.multi_reduction <add>, %54, %cst_43 [1] : vector<8x32xf32> to vector<8xf32>
    %58 = vector.shape_cast %57 : vector<8xf32> to vector<8x1xf32>
    %cst_44 = arith.constant 3.200000e+01 : f32
    %59 = vector.broadcast %cst_44 : f32 to vector<8x1xf32>
    %60 = arith.divf %58, %59 : vector<8x1xf32>
    %61 = vector.broadcast %60 : vector<8x1xf32> to vector<8x32xf32>
    %62 = arith.subf %54, %61 : vector<8x32xf32>
    %63 = arith.mulf %62, %62 : vector<8x32xf32>
    %cst_45 = arith.constant dense<0.000000e+00> : vector<8xf32>
    %64 = vector.multi_reduction <add>, %63, %cst_45 [1] : vector<8x32xf32> to vector<8xf32>
    %65 = vector.shape_cast %64 : vector<8xf32> to vector<8x1xf32>
    %cst_46 = arith.constant 3.200000e+01 : f32
    %66 = vector.broadcast %cst_46 : f32 to vector<8x1xf32>
    %67 = arith.divf %65, %66 : vector<8x1xf32>
    %68 = vector.broadcast %60 : vector<8x1xf32> to vector<8x32xf32>
    %69 = arith.subf %54, %68 : vector<8x32xf32>
    %cst_47 = arith.constant 9.99999996E-13 : f32
    %70 = vector.broadcast %cst_47 : f32 to vector<8x1xf32>
    %71 = arith.addf %67, %70 : vector<8x1xf32>
    %72 = math.rsqrt %71 : vector<8x1xf32>
    %73 = vector.broadcast %72 : vector<8x1xf32> to vector<8x32xf32>
    %74 = arith.mulf %69, %73 : vector<8x32xf32>
    %75 = vector.broadcast %55 : vector<1x32xf32> to vector<8x32xf32>
    %76 = arith.mulf %74, %75 : vector<8x32xf32>
    %77 = vector.broadcast %56 : vector<1x32xf32> to vector<8x32xf32>
    %78 = arith.addf %76, %77 : vector<8x32xf32>
    %79 = arith.truncf %78 : vector<8x32xf32> to vector<8x32xbf16>
    %cst_48 = arith.constant dense<0.000000e+00> : vector<8x128xf32>
    %80 = tpu.matmul %79, %4, %cst_48 {dimension_numbers = #tpu.dot_dimension_numbers<[1], [0], [0], [1], [0, 0, 1, 1], [], []>} : vector<8x32xbf16>, vector<32x128xbf16>, vector<8x128xf32> -> vector<8x128xf32>
    %c0_49 = arith.constant 0 : index
    %c0_50 = arith.constant 0 : index
    %81 = vector.load %arg13[%c0_49, %c0_50] : memref<1x128xf32, #tpu.memory_space<vmem>>, vector<1x128xf32>
    %82 = vector.broadcast %81 : vector<1x128xf32> to vector<8x128xf32>
    %83 = arith.addf %80, %82 : vector<8x128xf32>
    %cst_51 = arith.constant 5.000000e-01 : f32
    %84 = vector.broadcast %cst_51 : f32 to vector<8x128xf32>
    %85 = arith.mulf %84, %83 : vector<8x128xf32>
    %cst_52 = arith.constant 4.471500e-02 : f32
    %86 = vector.broadcast %cst_52 : f32 to vector<8x128xf32>
    %87 = arith.mulf %86, %83 : vector<8x128xf32>
    %88 = arith.mulf %87, %83 : vector<8x128xf32>
    %89 = arith.mulf %88, %83 : vector<8x128xf32>
    %90 = arith.addf %83, %89 : vector<8x128xf32>
    %cst_53 = arith.constant 0.797884583 : f32
    %91 = vector.broadcast %cst_53 : f32 to vector<8x128xf32>
    %92 = arith.mulf %91, %90 : vector<8x128xf32>
    %93 = math.tanh %92 : vector<8x128xf32>
    %cst_54 = arith.constant 1.000000e+00 : f32
    %94 = vector.broadcast %cst_54 : f32 to vector<8x128xf32>
    %95 = arith.addf %94, %93 : vector<8x128xf32>
    %96 = arith.mulf %85, %95 : vector<8x128xf32>
    %97 = arith.truncf %96 : vector<8x128xf32> to vector<8x128xbf16>
    %cst_55 = arith.constant dense<0.000000e+00> : vector<8x32xf32>
    %98 = tpu.matmul %97, %5, %cst_55 {dimension_numbers = #tpu.dot_dimension_numbers<[1], [0], [0], [1], [0, 0, 1, 1], [], []>} : vector<8x128xbf16>, vector<128x32xbf16>, vector<8x32xf32> -> vector<8x32xf32>
    %c0_56 = arith.constant 0 : index
    %c0_57 = arith.constant 0 : index
    %99 = vector.load %arg15[%c0_56, %c0_57] : memref<1x32xf32, #tpu.memory_space<vmem>>, vector<1x32xf32>
    %100 = vector.broadcast %99 : vector<1x32xf32> to vector<8x32xf32>
    %101 = arith.addf %98, %100 : vector<8x32xf32>
    %102 = arith.addf %78, %101 : vector<8x32xf32>
    %c0_58 = arith.constant 0 : index
    %c0_59 = arith.constant 0 : index
    %103 = vector.load %arg16[%c0_58, %c0_59] : memref<1x32xf32, #tpu.memory_space<vmem>>, vector<1x32xf32>
    %c0_60 = arith.constant 0 : index
    %c0_61 = arith.constant 0 : index
    %104 = vector.load %arg17[%c0_60, %c0_61] : memref<1x32xf32, #tpu.memory_space<vmem>>, vector<1x32xf32>
    %cst_62 = arith.constant dense<0.000000e+00> : vector<8xf32>
    %105 = vector.multi_reduction <add>, %102, %cst_62 [1] : vector<8x32xf32> to vector<8xf32>
    %106 = vector.shape_cast %105 : vector<8xf32> to vector<8x1xf32>
    %cst_63 = arith.constant 3.200000e+01 : f32
    %107 = vector.broadcast %cst_63 : f32 to vector<8x1xf32>
    %108 = arith.divf %106, %107 : vector<8x1xf32>
    %109 = vector.broadcast %108 : vector<8x1xf32> to vector<8x32xf32>
    %110 = arith.subf %102, %109 : vector<8x32xf32>
    %111 = arith.mulf %110, %110 : vector<8x32xf32>
    %cst_64 = arith.constant dense<0.000000e+00> : vector<8xf32>
    %112 = vector.multi_reduction <add>, %111, %cst_64 [1] : vector<8x32xf32> to vector<8xf32>
    %113 = vector.shape_cast %112 : vector<8xf32> to vector<8x1xf32>
    %cst_65 = arith.constant 3.200000e+01 : f32
    %114 = vector.broadcast %cst_65 : f32 to vector<8x1xf32>
    %115 = arith.divf %113, %114 : vector<8x1xf32>
    %116 = vector.broadcast %108 : vector<8x1xf32> to vector<8x32xf32>
    %117 = arith.subf %102, %116 : vector<8x32xf32>
    %cst_66 = arith.constant 9.99999996E-13 : f32
    %118 = vector.broadcast %cst_66 : f32 to vector<8x1xf32>
    %119 = arith.addf %115, %118 : vector<8x1xf32>
    %120 = math.rsqrt %119 : vector<8x1xf32>
    %121 = vector.broadcast %120 : vector<8x1xf32> to vector<8x32xf32>
    %122 = arith.mulf %117, %121 : vector<8x32xf32>
    %123 = vector.broadcast %103 : vector<1x32xf32> to vector<8x32xf32>
    %124 = arith.mulf %122, %123 : vector<8x32xf32>
    %125 = vector.broadcast %104 : vector<1x32xf32> to vector<8x32xf32>
    %126 = arith.addf %124, %125 : vector<8x32xf32>
    %127 = vector.extract_strided_slice %126 {offsets = [0, 0], sizes = [1, 32], strides = [1, 1]} : vector<8x32xf32> to vector<1x32xf32>
    %128 = arith.truncf %127 : vector<1x32xf32> to vector<1x32xbf16>
    %cst_67 = arith.constant dense<0.000000e+00> : vector<1x32xf32>
    %129 = tpu.matmul %128, %6, %cst_67 {dimension_numbers = #tpu.dot_dimension_numbers<[1], [0], [0], [1], [0, 0, 1, 1], [], []>} : vector<1x32xbf16>, vector<32x32xbf16>, vector<1x32xf32> -> vector<1x32xf32>
    %c0_68 = arith.constant 0 : index
    %c0_69 = arith.constant 0 : index
    %130 = vector.load %arg19[%c0_68, %c0_69] : memref<1x32xf32, #tpu.memory_space<vmem>>, vector<1x32xf32>
    %131 = arith.addf %129, %130 : vector<1x32xf32>
    %132 = math.tanh %131 : vector<1x32xf32>
    %133 = arith.truncf %132 : vector<1x32xf32> to vector<1x32xbf16>
    %cst_70 = arith.constant dense<0.000000e+00> : vector<1x128xf32>
    %134 = tpu.matmul %133, %7, %cst_70 {dimension_numbers = #tpu.dot_dimension_numbers<[1], [0], [0], [1], [0, 0, 1, 1], [], []>} : vector<1x32xbf16>, vector<32x128xbf16>, vector<1x128xf32> -> vector<1x128xf32>
    %c0_71 = arith.constant 0 : index
    %c0_72 = arith.constant 0 : index
    %135 = vector.load %arg21[%c0_71, %c0_72] : memref<1x128xf32, #tpu.memory_space<vmem>>, vector<1x128xf32>
    %136 = arith.addf %134, %135 : vector<1x128xf32>
    %c0_73 = arith.constant 0 : index
    %c0_74 = arith.constant 0 : index
    %137 = vector.load %arg22[%c0_73, %c0_74] : memref<2x128xf32, #tpu.memory_space<vmem>>, vector<1x128xf32>
    tpu.vector_store %arg22[%c0_73, %c0_74], %136 {strides = array<i32>} : memref<2x128xf32, #tpu.memory_space<vmem>>, vector<1x128xf32>,
    %c1 = arith.constant 1 : index
    %c0_75 = arith.constant 0 : index
    %c0_76 = arith.constant 0 : index
    %138 = vector.load %arg0[%c1, %c0_75, %c0_76] : memref<2x8x32xf32, #tpu.memory_space<vmem>>, vector<1x8x32xf32>
    %139 = vector.shape_cast %138 : vector<1x8x32xf32> to vector<8x32xf32>
    %c1_77 = arith.constant 1 : index
    %c0_78 = arith.constant 0 : index
    %c0_79 = arith.constant 0 : index
    %140 = vector.load %arg1[%c1_77, %c0_78, %c0_79] : memref<2x1x8xf32, #tpu.memory_space<vmem>>, vector<1x1x8xf32>
    %141 = vector.shape_cast %140 : vector<1x1x8xf32> to vector<1x8xf32>
    %142 = arith.truncf %139 : vector<8x32xf32> to vector<8x32xbf16>
    %cst_80 = arith.constant dense<0.000000e+00> : vector<8x32xf32>
    %143 = tpu.matmul %142, %0, %cst_80 {dimension_numbers = #tpu.dot_dimension_numbers<[1], [0], [0], [1], [0, 0, 1, 1], [], []>} : vector<8x32xbf16>, vector<32x32xbf16>, vector<8x32xf32> -> vector<8x32xf32>
    %c0_81 = arith.constant 0 : index
    %c0_82 = arith.constant 0 : index
    %144 = vector.load %arg3[%c0_81, %c0_82] : memref<1x32xf32, #tpu.memory_space<vmem>>, vector<1x32xf32>
    %145 = vector.broadcast %144 : vector<1x32xf32> to vector<8x32xf32>
    %146 = arith.addf %143, %145 : vector<8x32xf32>
    %cst_83 = arith.constant dense<0.000000e+00> : vector<8x32xf32>
    %147 = tpu.matmul %142, %1, %cst_83 {dimension_numbers = #tpu.dot_dimension_numbers<[1], [0], [0], [1], [0, 0, 1, 1], [], []>} : vector<8x32xbf16>, vector<32x32xbf16>, vector<8x32xf32> -> vector<8x32xf32>
    %c0_84 = arith.constant 0 : index
    %c0_85 = arith.constant 0 : index
    %148 = vector.load %arg5[%c0_84, %c0_85] : memref<1x32xf32, #tpu.memory_space<vmem>>, vector<1x32xf32>
    %149 = vector.broadcast %148 : vector<1x32xf32> to vector<8x32xf32>
    %150 = arith.addf %147, %149 : vector<8x32xf32>
    %cst_86 = arith.constant dense<0.000000e+00> : vector<8x32xf32>
    %151 = tpu.matmul %142, %2, %cst_86 {dimension_numbers = #tpu.dot_dimension_numbers<[1], [0], [0], [1], [0, 0, 1, 1], [], []>} : vector<8x32xbf16>, vector<32x32xbf16>, vector<8x32xf32> -> vector<8x32xf32>
    %c0_87 = arith.constant 0 : index
    %c0_88 = arith.constant 0 : index
    %152 = vector.load %arg7[%c0_87, %c0_88] : memref<1x32xf32, #tpu.memory_space<vmem>>, vector<1x32xf32>
    %153 = vector.broadcast %152 : vector<1x32xf32> to vector<8x32xf32>
    %154 = arith.addf %151, %153 : vector<8x32xf32>
    %155 = arith.truncf %146 : vector<8x32xf32> to vector<8x32xbf16>
    %156 = arith.truncf %150 : vector<8x32xf32> to vector<8x32xbf16>
    %cst_89 = arith.constant dense<0.000000e+00> : vector<8x8xf32>
    %157 = tpu.matmul %155, %156, %cst_89 {dimension_numbers = #tpu.dot_dimension_numbers<[1], [1], [0], [0], [0, 0, 1, 0], [], []>} : vector<8x32xbf16>, vector<8x32xbf16>, vector<8x8xf32> -> vector<8x8xf32>
    %cst_90 = arith.constant 0.176776692 : f32
    %158 = vector.broadcast %cst_90 : f32 to vector<8x8xf32>
    %159 = arith.mulf %157, %158 : vector<8x8xf32>
    %cst_91 = arith.constant 0.000000e+00 : f32
    %160 = vector.broadcast %cst_91 : f32 to vector<1x8xf32>
    %161 = arith.cmpf ogt, %141, %160 : vector<1x8xf32>
    %cst_92 = arith.constant -1.000000e+09 : f32
    %162 = vector.shape_cast %161 : vector<1x8xi1> to vector<1x8xi1>
    %163 = vector.broadcast %162 : vector<1x8xi1> to vector<8x8xi1>
    %164 = vector.broadcast %cst_92 : f32 to vector<8x8xf32>
    %165 = arith.select %163, %159, %164 : vector<8x8xi1>, vector<8x8xf32>
    %cst_93 = arith.constant dense<0xFF800000> : vector<8xf32>
    %166 = vector.multi_reduction <maximumf>, %165, %cst_93 [1] : vector<8x8xf32> to vector<8xf32>
    %167 = vector.shape_cast %166 : vector<8xf32> to vector<8x1xf32>
    %168 = vector.broadcast %167 : vector<8x1xf32> to vector<8x8xf32>
    %169 = arith.subf %165, %168 : vector<8x8xf32>
    %170 = math.exp %169 : vector<8x8xf32>
    %cst_94 = arith.constant dense<0.000000e+00> : vector<8xf32>
    %171 = vector.multi_reduction <add>, %170, %cst_94 [1] : vector<8x8xf32> to vector<8xf32>
    %172 = vector.shape_cast %171 : vector<8xf32> to vector<8x1xf32>
    %173 = tpu.reciprocal %172 {approx = true} : vector<8x1xf32> -> vector<8x1xf32>
    %174 = vector.broadcast %173 : vector<8x1xf32> to vector<8x8xf32>
    %175 = arith.mulf %170, %174 : vector<8x8xf32>
    %176 = arith.truncf %175 : vector<8x8xf32> to vector<8x8xbf16>
    %177 = arith.truncf %154 : vector<8x32xf32> to vector<8x32xbf16>
    %cst_95 = arith.constant dense<0.000000e+00> : vector<8x32xf32>
    %178 = tpu.matmul %176, %177, %cst_95 {dimension_numbers = #tpu.dot_dimension_numbers<[1], [0], [0], [1], [0, 0, 1, 1], [], []>} : vector<8x8xbf16>, vector<8x32xbf16>, vector<8x32xf32> -> vector<8x32xf32>
    %179 = arith.truncf %178 : vector<8x32xf32> to vector<8x32xbf16>
    %cst_96 = arith.constant dense<0.000000e+00> : vector<8x32xf32>
    %180 = tpu.matmul %179, %3, %cst_96 {dimension_numbers = #tpu.dot_dimension_numbers<[1], [0], [0], [1], [0, 0, 1, 1], [], []>} : vector<8x32xbf16>, vector<32x32xbf16>, vector<8x32xf32> -> vector<8x32xf32>
    %c0_97 = arith.constant 0 : index
    %c0_98 = arith.constant 0 : index
    %181 = vector.load %arg9[%c0_97, %c0_98] : memref<1x32xf32, #tpu.memory_space<vmem>>, vector<1x32xf32>
    %182 = vector.broadcast %181 : vector<1x32xf32> to vector<8x32xf32>
    %183 = arith.addf %180, %182 : vector<8x32xf32>
    %184 = arith.addf %139, %183 : vector<8x32xf32>
    %c0_99 = arith.constant 0 : index
    %c0_100 = arith.constant 0 : index
    %185 = vector.load %arg10[%c0_99, %c0_100] : memref<1x32xf32, #tpu.memory_space<vmem>>, vector<1x32xf32>
    %c0_101 = arith.constant 0 : index
    %c0_102 = arith.constant 0 : index
    %186 = vector.load %arg11[%c0_101, %c0_102] : memref<1x32xf32, #tpu.memory_space<vmem>>, vector<1x32xf32>
    %cst_103 = arith.constant dense<0.000000e+00> : vector<8xf32>
    %187 = vector.multi_reduction <add>, %184, %cst_103 [1] : vector<8x32xf32> to vector<8xf32>
    %188 = vector.shape_cast %187 : vector<8xf32> to vector<8x1xf32>
    %cst_104 = arith.constant 3.200000e+01 : f32
    %189 = vector.broadcast %cst_104 : f32 to vector<8x1xf32>
    %190 = arith.divf %188, %189 : vector<8x1xf32>
    %191 = vector.broadcast %190 : vector<8x1xf32> to vector<8x32xf32>
    %192 = arith.subf %184, %191 : vector<8x32xf32>
    %193 = arith.mulf %192, %192 : vector<8x32xf32>
    %cst_105 = arith.constant dense<0.000000e+00> : vector<8xf32>
    %194 = vector.multi_reduction <add>, %193, %cst_105 [1] : vector<8x32xf32> to vector<8xf32>
    %195 = vector.shape_cast %194 : vector<8xf32> to vector<8x1xf32>
    %cst_106 = arith.constant 3.200000e+01 : f32
    %196 = vector.broadcast %cst_106 : f32 to vector<8x1xf32>
    %197 = arith.divf %195, %196 : vector<8x1xf32>
    %198 = vector.broadcast %190 : vector<8x1xf32> to vector<8x32xf32>
    %199 = arith.subf %184, %198 : vector<8x32xf32>
    %cst_107 = arith.constant 9.99999996E-13 : f32
    %200 = vector.broadcast %cst_107 : f32 to vector<8x1xf32>
    %201 = arith.addf %197, %200 : vector<8x1xf32>
    %202 = math.rsqrt %201 : vector<8x1xf32>
    %203 = vector.broadcast %202 : vector<8x1xf32> to vector<8x32xf32>
    %204 = arith.mulf %199, %203 : vector<8x32xf32>
    %205 = vector.broadcast %185 : vector<1x32xf32> to vector<8x32xf32>
    %206 = arith.mulf %204, %205 : vector<8x32xf32>
    %207 = vector.broadcast %186 : vector<1x32xf32> to vector<8x32xf32>
    %208 = arith.addf %206, %207 : vector<8x32xf32>
    %209 = arith.truncf %208 : vector<8x32xf32> to vector<8x32xbf16>
    %cst_108 = arith.constant dense<0.000000e+00> : vector<8x128xf32>
    %210 = tpu.matmul %209, %4, %cst_108 {dimension_numbers = #tpu.dot_dimension_numbers<[1], [0], [0], [1], [0, 0, 1, 1], [], []>} : vector<8x32xbf16>, vector<32x128xbf16>, vector<8x128xf32> -> vector<8x128xf32>
    %c0_109 = arith.constant 0 : index
    %c0_110 = arith.constant 0 : index
    %211 = vector.load %arg13[%c0_109, %c0_110] : memref<1x128xf32, #tpu.memory_space<vmem>>, vector<1x128xf32>
    %212 = vector.broadcast %211 : vector<1x128xf32> to vector<8x128xf32>
    %213 = arith.addf %210, %212 : vector<8x128xf32>
    %cst_111 = arith.constant 5.000000e-01 : f32
    %214 = vector.broadcast %cst_111 : f32 to vector<8x128xf32>
    %215 = arith.mulf %214, %213 : vector<8x128xf32>
    %cst_112 = arith.constant 4.471500e-02 : f32
    %216 = vector.broadcast %cst_112 : f32 to vector<8x128xf32>
    %217 = arith.mulf %216, %213 : vector<8x128xf32>
    %218 = arith.mulf %217, %213 : vector<8x128xf32>
    %219 = arith.mulf %218, %213 : vector<8x128xf32>
    %220 = arith.addf %213, %219 : vector<8x128xf32>
    %cst_113 = arith.constant 0.797884583 : f32
    %221 = vector.broadcast %cst_113 : f32 to vector<8x128xf32>
    %222 = arith.mulf %221, %220 : vector<8x128xf32>
    %223 = math.tanh %222 : vector<8x128xf32>
    %cst_114 = arith.constant 1.000000e+00 : f32
    %224 = vector.broadcast %cst_114 : f32 to vector<8x128xf32>
    %225 = arith.addf %224, %223 : vector<8x128xf32>
    %226 = arith.mulf %215, %225 : vector<8x128xf32>
    %227 = arith.truncf %226 : vector<8x128xf32> to vector<8x128xbf16>
    %cst_115 = arith.constant dense<0.000000e+00> : vector<8x32xf32>
    %228 = tpu.matmul %227, %5, %cst_115 {dimension_numbers = #tpu.dot_dimension_numbers<[1], [0], [0], [1], [0, 0, 1, 1], [], []>} : vector<8x128xbf16>, vector<128x32xbf16>, vector<8x32xf32> -> vector<8x32xf32>
    %c0_116 = arith.constant 0 : index
    %c0_117 = arith.constant 0 : index
    %229 = vector.load %arg15[%c0_116, %c0_117] : memref<1x32xf32, #tpu.memory_space<vmem>>, vector<1x32xf32>
    %230 = vector.broadcast %229 : vector<1x32xf32> to vector<8x32xf32>
    %231 = arith.addf %228, %230 : vector<8x32xf32>
    %232 = arith.addf %208, %231 : vector<8x32xf32>
    %c0_118 = arith.constant 0 : index
    %c0_119 = arith.constant 0 : index
    %233 = vector.load %arg16[%c0_118, %c0_119] : memref<1x32xf32, #tpu.memory_space<vmem>>, vector<1x32xf32>
    %c0_120 = arith.constant 0 : index
    %c0_121 = arith.constant 0 : index
    %234 = vector.load %arg17[%c0_120, %c0_121] : memref<1x32xf32, #tpu.memory_space<vmem>>, vector<1x32xf32>
    %cst_122 = arith.constant dense<0.000000e+00> : vector<8xf32>
    %235 = vector.multi_reduction <add>, %232, %cst_122 [1] : vector<8x32xf32> to vector<8xf32>
    %236 = vector.shape_cast %235 : vector<8xf32> to vector<8x1xf32>
    %cst_123 = arith.constant 3.200000e+01 : f32
    %237 = vector.broadcast %cst_123 : f32 to vector<8x1xf32>
    %238 = arith.divf %236, %237 : vector<8x1xf32>
    %239 = vector.broadcast %238 : vector<8x1xf32> to vector<8x32xf32>
    %240 = arith.subf %232, %239 : vector<8x32xf32>
    %241 = arith.mulf %240, %240 : vector<8x32xf32>
    %cst_124 = arith.constant dense<0.000000e+00> : vector<8xf32>
    %242 = vector.multi_reduction <add>, %241, %cst_124 [1] : vector<8x32xf32> to vector<8xf32>
    %243 = vector.shape_cast %242 : vector<8xf32> to vector<8x1xf32>
    %cst_125 = arith.constant 3.200000e+01 : f32
    %244 = vector.broadcast %cst_125 : f32 to vector<8x1xf32>
    %245 = arith.divf %243, %244 : vector<8x1xf32>
    %246 = vector.broadcast %238 : vector<8x1xf32> to vector<8x32xf32>
    %247 = arith.subf %232, %246 : vector<8x32xf32>
    %cst_126 = arith.constant 9.99999996E-13 : f32
    %248 = vector.broadcast %cst_126 : f32 to vector<8x1xf32>
    %249 = arith.addf %245, %248 : vector<8x1xf32>
    %250 = math.rsqrt %249 : vector<8x1xf32>
    %251 = vector.broadcast %250 : vector<8x1xf32> to vector<8x32xf32>
    %252 = arith.mulf %247, %251 : vector<8x32xf32>
    %253 = vector.broadcast %233 : vector<1x32xf32> to vector<8x32xf32>
    %254 = arith.mulf %252, %253 : vector<8x32xf32>
    %255 = vector.broadcast %234 : vector<1x32xf32> to vector<8x32xf32>
    %256 = arith.addf %254, %255 : vector<8x32xf32>
    %257 = vector.extract_strided_slice %256 {offsets = [0, 0], sizes = [1, 32], strides = [1, 1]} : vector<8x32xf32> to vector<1x32xf32>
    %258 = arith.truncf %257 : vector<1x32xf32> to vector<1x32xbf16>
    %cst_127 = arith.constant dense<0.000000e+00> : vector<1x32xf32>
    %259 = tpu.matmul %258, %6, %cst_127 {dimension_numbers = #tpu.dot_dimension_numbers<[1], [0], [0], [1], [0, 0, 1, 1], [], []>} : vector<1x32xbf16>, vector<32x32xbf16>, vector<1x32xf32> -> vector<1x32xf32>
    %c0_128 = arith.constant 0 : index
    %c0_129 = arith.constant 0 : index
    %260 = vector.load %arg19[%c0_128, %c0_129] : memref<1x32xf32, #tpu.memory_space<vmem>>, vector<1x32xf32>
    %261 = arith.addf %259, %260 : vector<1x32xf32>
    %262 = math.tanh %261 : vector<1x32xf32>
    %263 = arith.truncf %262 : vector<1x32xf32> to vector<1x32xbf16>
    %cst_130 = arith.constant dense<0.000000e+00> : vector<1x128xf32>
    %264 = tpu.matmul %263, %7, %cst_130 {dimension_numbers = #tpu.dot_dimension_numbers<[1], [0], [0], [1], [0, 0, 1, 1], [], []>} : vector<1x32xbf16>, vector<32x128xbf16>, vector<1x128xf32> -> vector<1x128xf32>
    %c0_131 = arith.constant 0 : index
    %c0_132 = arith.constant 0 : index
    %265 = vector.load %arg21[%c0_131, %c0_132] : memref<1x128xf32, #tpu.memory_space<vmem>>, vector<1x128xf32>
    %266 = arith.addf %264, %265 : vector<1x128xf32>
    %c1_133 = arith.constant 1 : index
    %c0_134 = arith.constant 0 : index
    %267 = vector.load %arg22[%c1_133, %c0_134] : memref<2x128xf32, #tpu.memory_space<vmem>>, vector<1x128xf32>
    tpu.vector_store %arg22[%c1_133, %c0_134], %266 {strides = array<i32>} : memref<2x128xf32, #tpu.memory_space<vmem>>, vector<1x128xf32>,
    return
  }
}

</mosaic_0001>

<bundles_post_ra>
// kernel: tpu_custom_call.1
= control target key start
LH: loop header
LB: loop body
LE: loop exit
PB: predicated region body
PF: predicated region fallthrough
CT: control target
= control target key end

     0   :  { %s1976_s0 = inlined_call_operand.vmem [shape: f32[2,8,32], index: 0, kind: input, shape index: {}]   ;;  %s1977_s1 = inlined_call_operand.hbm [shape: f32[2,1,8], index: 1, kind: input, shape index: {}]   ;;  %s1978_s2 = inlined_call_operand.vmem [shape: bf16[32,32], index: 2, kind: input, shape index: {}]   ;;  %s1979_s3 = inlined_call_operand.vmem [shape: f32[1,32], index: 3, kind: input, shape index: {}]   ;;  %s1980_s4 = inlined_call_operand.vmem [shape: bf16[32,32], index: 4, kind: input, shape index: {}]   ;;  %s1981_s5 = inlined_call_operand.hbm [shape: f32[1,32], index: 5, kind: input, shape index: {}]   ;;  %s1982_s6 = inlined_call_operand.vmem [shape: bf16[32,32], index: 6, kind: input, shape index: {}]   ;;  %s1983_s7 = inlined_call_operand.hbm [shape: f32[1,32], index: 7, kind: input, shape index: {}]   ;;  %s1984_s8 = inlined_call_operand.vmem [shape: bf16[32,32], index: 8, kind: input, shape index: {}]   ;;  %s1985_s9 = inlined_call_operand.hbm [shape: f32[1,32], index: 9, kind: input, shape index: {}]   ;;  %s1986_s10 = inlined_call_operand.hbm [shape: f32[1,32], index: 10, kind: input, shape index: {}]   ;;  %s1987_s11 = inlined_call_operand.hbm [shape: f32[1,32], index: 11, kind: input, shape index: {}]   ;;  %s1988_s12 = inlined_call_operand.hbm [shape: bf16[32,128], index: 12, kind: input, shape index: {}]   ;;  %s1989_s13 = inlined_call_operand.hbm [shape: f32[1,128], index: 13, kind: input, shape index: {}]   ;;  %s1990_s14 = inlined_call_operand.vmem [shape: bf16[128,32], index: 14, kind: input, shape index: {}]   ;;  %s1991_s15 = inlined_call_operand.hbm [shape: f32[1,32], index: 15, kind: input, shape index: {}]   ;;  %s1992_s16 = inlined_call_operand.hbm [shape: f32[1,32], index: 16, kind: input, shape index: {}]   ;;  %s1993_s17 = inlined_call_operand.hbm [shape: f32[1,32], index: 17, kind: input, shape index: {}]   ;;  %s1994_s18 = inlined_call_operand.vmem [shape: bf16[32,32], index: 18, kind: input, shape index: {}]   ;;  %s1995_s19 = inlined_call_operand.hbm [shape: f32[1,32], index: 19, kind: input, shape index: {}]   ;;  %s1996_s20 = inlined_call_operand.hbm [shape: bf16[32,128], index: 20, kind: input, shape index: {}]   ;;  %s1997_s21 = inlined_call_operand.vmem [shape: f32[1,128], index: 21, kind: input, shape index: {}]   ;;  %s1998_s22 = inlined_call_operand.hbm [shape: f32[2,128], index: 22, kind: output, shape index: {}]  }
   0x1   :  { %2004 = sst [smem:[#allocation32_spill]] %s1976_s0 }
   0x2   :  { %2005 = sst [smem:[#allocation33_spill]] %s1977_s1 }
   0x3   :  { %2006 = sst [smem:[#allocation34_spill]] %s1978_s2 }
   0x4   :  { %2007 = sst [smem:[#allocation35_spill]] %s1979_s3 }
   0x5   :  { %2008 = sst [smem:[#allocation36_spill]] %s1980_s4 }
   0x6   :  { %2009 = sst [smem:[#allocation37_spill]] %s1981_s5 }
   0x7   :  { %2010 = sst [smem:[#allocation38_spill]] %s1982_s6 }
   0x8   :  { %27 = vsyncpa [#allocation3], 0 }
   0x9   :  { %28 = vsyncpa [#allocation6], 0 }
   0xa   :  { %29 = vsyncpa [#allocation9], 0 }
   0xb   :  { %30 = vsyncpa [#allocation12], 0 }
   0xc   :  { %31 = vsyncpa [#allocation15], 0 }
   0xd   :  { %32 = vsyncpa [#allocation18], 0 }
   0xe   :  { %33 = vsyncpa [#allocation21], 0  ;;  %s2011_s29 = sld [smem:[#allocation37_spill]] }
  0x14   :  { %s61_s30 = sshll.u32 %s2011_s29, 4  ;;  %s62_s30 = int_to_ptr.hbm [resolvable:$true] %s61_s30 }
  0x15   :  { %34 = vsyncpa [#allocation4], 0  ;;  %s1591_s4 = smov [#allocation5]   ;;  %s87_s5 = sshll.u32 %s1985_s9, 4  ;;  %s88_s5 = int_to_ptr.hbm [resolvable:$true] %s87_s5 }
  0x16   :  { %s63_s0 = sshll.u32 %s1591_s4, 4  ;;  %s1592_s24 = smov [#allocation8]   ;;  %s64_s0 = int_to_ptr.vmem [resolvable:$true] %s63_s0 }
  0x17   :  { %66 = dma.hbm_to_vmem [thread:$0]  %s62_s30, 16, %s64_s0, [#allocation6]  }
  0x18   :  { %s89_s6 = sshll.u32 %s1592_s24, 4  ;;  %s109_s2 = sshll.u32 %s1987_s11, 4  ;;  %s90_s6 = int_to_ptr.vmem [resolvable:$true] %s89_s6  ;;  %s110_s2 = int_to_ptr.hbm [resolvable:$true] %s109_s2 }
  0x19   :  { %92 = dma.hbm_to_vmem [thread:$0]  %s88_s5, 16, %s90_s6, [#allocation9]  }
  0x1a   :  { %s133_s28 = sshll.u32 %s1989_s13, 4  ;;  %s1593_s29 = smov [#allocation11]   ;;  %s134_s28 = int_to_ptr.hbm [resolvable:$true] %s133_s28 }
  0x1b   :  { %s111_s4 = sshll.u32 %s1593_s29, 4  ;;  %s1594_s9 = smov [#allocation14]   ;;  %s112_s4 = int_to_ptr.vmem [resolvable:$true] %s111_s4 }
  0x1c   :  { %114 = dma.hbm_to_vmem [thread:$0]  %s110_s2, 16, %s112_s4, [#allocation12]  }
  0x1d   :  { %s135_s30 = sshll.u32 %s1594_s9, 4  ;;  %s157_s1 = sshll.u32 %s1992_s16, 4  ;;  %s136_s30 = int_to_ptr.vmem [resolvable:$true] %s135_s30  ;;  %s158_s1 = int_to_ptr.hbm [resolvable:$true] %s157_s1 }
  0x1e   :  { %138 = dma.hbm_to_vmem [thread:$0]  %s134_s28, 16, %s136_s30, [#allocation15]  }
  0x1f   :  { %s181_s24 = sshll.u32 %s1995_s19, 4  ;;  %s1595_s6 = smov [#allocation17]   ;;  %s182_s24 = int_to_ptr.hbm [resolvable:$true] %s181_s24 }
  0x20   :  { %s159_s13 = sshll.u32 %s1595_s6, 4  ;;  %s1596_s25 = smov [#allocation20]   ;;  %s160_s13 = int_to_ptr.vmem [resolvable:$true] %s159_s13 }
  0x21   :  { %162 = dma.hbm_to_vmem [thread:$0]  %s158_s1, 16, %s160_s13, [#allocation18]  }
  0x22   :  { %s183_s26 = sshll.u32 %s1596_s25, 4  ;;  %s2012_s3 = sld [smem:[#allocation33_spill]]  ;;  %s184_s26 = int_to_ptr.vmem [resolvable:$true] %s183_s26 }
  0x23   :  { %186 = dma.hbm_to_vmem [thread:$0]  %s182_s24, 16, %s184_s26, [#allocation21]  }
  0x24   :  { %s1597_s16 = smov [#allocation2]   ;;  %s74_s19 = sshll.u32 %s1983_s7, 4  ;;  %s75_s19 = int_to_ptr.hbm [resolvable:$true] %s74_s19 }
  0x25   :  { %s43_s28 = sshll.u32 %s1597_s16, 4  ;;  %s1598_s30 = smov 16   ;;  %s44_s28 = int_to_ptr.vmem [resolvable:$true] %s43_s28 }
  0x26   :  { %s1599_s0 = smov 1   ;;  %s1600_s23 = smov [#allocation7]  }
  0x27   :  { %s76_s1 = sshll.u32 %s1600_s23, 4  ;;  %s98_s6 = sshll.u32 %s1986_s10, 4  ;;  %s77_s1 = int_to_ptr.vmem [resolvable:$true] %s76_s1  ;;  %s99_s6 = int_to_ptr.hbm [resolvable:$true] %s98_s6 }
  0x28   :  { %s41_s29 = sshll.u32 %s2012_s3, 4  ;;  %s119_s25 = sshll.u32 %s1988_s12, 4  ;;  %s42_s29 = int_to_ptr.hbm [resolvable:$true] %s41_s29  ;;  %s120_s25 = int_to_ptr.hbm [resolvable:$true] %s119_s25 }
  0x29   :  { %49 = dma.hbm_to_vmem [thread:$0]  %s42_s29, 32, %s44_s28, [#allocation3], %s1598_s30, %s1598_s30, %s1599_s0  }
  0x2a   :  { %79 = dma.hbm_to_vmem [thread:$0]  %s75_s19, 16, %s77_s1, [#allocation6]  }
  0x2b   :  { %s1601_s26 = smov [#allocation10]   ;;  %s1602_s7 = smov [#allocation13]  }
  0x2c   :  { %s100_s2 = sshll.u32 %s1601_s26, 4  ;;  %s121_s27 = sshll.u32 %s1602_s7, 4  ;;  %s101_s2 = int_to_ptr.vmem [resolvable:$true] %s100_s2  ;;  %s122_s27 = int_to_ptr.vmem [resolvable:$true] %s121_s27 }
  0x2d   :  { %103 = dma.hbm_to_vmem [thread:$0]  %s99_s6, 16, %s101_s2, [#allocation9]  }
  0x2e   :  { %s1603_s3 = smov 64   ;;  %s1604_s29 = smov 4  }
  0x2f   :  { %127 = dma.hbm_to_vmem [thread:$0]  %s120_s25, 256, %s122_s27, [#allocation12], %s1603_s3, %s1603_s3, %s1604_s29  }
  0x30   :  { %s146_s28 = sshll.u32 %s1991_s15, 4  ;;  %s1605_s4 = smov [#allocation16]   ;;  %s147_s28 = int_to_ptr.hbm [resolvable:$true] %s146_s28 }
  0x31   :  { %s148_s9 = sshll.u32 %s1605_s4, 4  ;;  %s168_s30 = sshll.u32 %s1993_s17, 4  ;;  %s149_s9 = int_to_ptr.vmem [resolvable:$true] %s148_s9  ;;  %s169_s30 = int_to_ptr.hbm [resolvable:$true] %s168_s30 }
  0x32   :  { %151 = dma.hbm_to_vmem [thread:$0]  %s147_s28, 16, %s149_s9, [#allocation15]  }
  0x33   :  { %s1606_s0 = smov [#allocation19]   ;;  %s191_s5 = sshll.u32 %s1996_s20, 4  ;;  %s192_s5 = int_to_ptr.hbm [resolvable:$true] %s191_s5 }
  0x34   :  { %s170_s23 = sshll.u32 %s1606_s0, 4  ;;  %s1607_s15 = smov [#allocation22]   ;;  %s171_s23 = int_to_ptr.vmem [resolvable:$true] %s170_s23 }
  0x35   :  { %173 = dma.hbm_to_vmem [thread:$0]  %s169_s30, 16, %s171_s23, [#allocation18]  }
  0x36   :  { %s193_s6 = sshll.u32 %s1607_s15, 4  ;;  %s194_s6 = int_to_ptr.vmem [resolvable:$true] %s193_s6 }
  0x37   :  { %199 = dma.hbm_to_vmem [thread:$0]  %s192_s5, 256, %s194_s6, [#allocation21], %s1603_s3, %s1603_s3, %s1604_s29  }
  0x38   :  { %1575 = dma.done.wait [#allocation3], 32  }
  0x39   :  { %1576 = vsyncadd [#allocation3], 4294967264 }
  0x3a   :  { %1577 = dma.done.wait [#allocation6], 32  }
  0x3b   :  { %1578 = vsyncadd [#allocation6], 4294967264 }
  0x3c   :  { %1579 = dma.done.wait [#allocation9], 32  }
  0x3d   :  { %1580 = vsyncadd [#allocation9], 4294967264 }
  0x3e   :  { %1581 = dma.done.wait [#allocation12], 272  }
  0x3f   :  { %1582 = vsyncadd [#allocation12], 4294967024 }
  0x40   :  { %1583 = dma.done.wait [#allocation15], 32  }
  0x41   :  { %1584 = vsyncadd [#allocation15], 4294967264 }
  0x42   :  { %1585 = dma.done.wait [#allocation18], 32  }
  0x43   :  { %1586 = vsyncadd [#allocation18], 4294967264 }
  0x44   :  { %1587 = dma.done.wait [#allocation21], 272  }
  0x45   :  { %1588 = vsyncadd [#allocation21], 4294967024  ;;  %s2013_s24 = sld [smem:[#allocation34_spill]]  ;;  %vm318_vm0 = vcmask 261120   ;;  %v1194_v6 = vld [vmem:[#allocation5] ss:$0 sm:$0xff] }
  0x46   :  { %s2014_s26 = sld [smem:[#allocation36_spill]]  ;;  %v300_v19 = vld [vmem:[#allocation2] sm:$0x1]  ;;  %v1608_v20 = vmov 0   ;;  %vm420_vm3 = vcmask 64512   ;;  %vm437_vm4 = vcmask 1043456  }
  0x47   :  { %s2015_s10 = sld [smem:[#allocation32_spill]]  ;;  %vm415_vm1 = vcmp.gt.f32.partialorder %v300_v19, 0.0  ;;  %v1195_v35 = vld [vmem:[#allocation7] ss:$0 sm:$0xff]  ;;  %v1823_v39 = vld [vmem:[%s1984_s8 + $0x8] sm:$0xff]  ;;  %v1609_v54 = vmov 32.0  }
  0x48   :  { %s2016_s9 = sld [smem:[#allocation35_spill]]  ;;  %v416_v21 = vsel %vm415_vm1, 1, %v1608_v20  ;;  %v1830_v44 = vld [vmem:[%s1984_s8] sm:$0xff]  ;;  %s1610_s15 = smov [#allocation23]  }
  0x49   :  { %s2017_s30 = sld [smem:[#allocation38_spill]]  ;;  %v417_v22 = vperm.slane %v416_v21, 0  ;;  %v1196_v48 = vld [vmem:[#allocation8] ss:$0 sm:$0xff]  ;;  %v1197_v21 = vld [vmem:[#allocation10] ss:$0 sm:$0xff] }
  0x4a   :  { %s1026_s8 = sshll.u32 %s1610_s15, 4  ;;  %s1028_s20 = sshll.u32 %s1998_s22, 4  ;;  %s1027_s8 = int_to_ptr.vmem [resolvable:$true] %s1026_s8  ;;  %s1029_s20 = int_to_ptr.hbm [resolvable:$true] %s1028_s20 }
  0x4b   :  { %v1768_v0 = vld [vmem:[%s2013_s24 + $0x8] sm:$0xff]  ;;  %v1778_v2 = vld [vmem:[%s2013_s24] sm:$0xff]  ;;  %vm418_vm2 = vcmp.eq.s32.totalorder %v417_v22, 1 }
  0x4c   :  { %v1773_v1 = vld [vmem:[%s2014_s26 + $0x8] sm:$0xff]  ;;  %v1783_v3 = vld [vmem:[%s2014_s26] sm:$0xff]  ;;  %328 = vmatpush.bf16.msra.mxu0 %v1768_v0 }
  0x4d   :  { %357 = vmatpush.bf16.msra.mxu1 %v1773_v1  ;;  %v1790_v4 = vld [vmem:[%s2015_s10] sm:$0xff] }
  0x4e   :  { %v301_v5 = vpack.c.bf16 %v1790_v4, %v1790_v4  ;;  %v1193_v9 = vld [vmem:[%s2016_s9] ss:$0 sm:$0xff] }
  0x4f   :  { %v1806_v17 = vld [vmem:[%s2017_s30 + $0x8] sm:$0xff]  ;;  %v1812_v18 = vld [vmem:[%s2017_s30] sm:$0xff] }
  0x50   :  { %329 = vmatpush.bf16.msra.mxu0 %v1778_v2  ;;  %386 = vmatpush.bf16.msra.mxu2 %v1806_v17 }
  0x51   :  { %358 = vmatpush.bf16.msra.mxu1 %v1783_v3 }
  0x53   :  { %1052 = vmatmul.msk.bf16.vlgmr.msra.gmra.mxu0 %vm318_vm0, %v301_v5 }
  0x54   :  { %1061 = vmatmul.msk.bf16.vlgmr.msra.gmra.mxu1 %vm318_vm0, %v301_v5  ;;  %387 = vmatpush.bf16.msra.mxu2 %v1812_v18 }
  0x55   :  { %480 = vmatpush.bf16.msrb.mxu1 %v1823_v39 }
  0x57   :  { %1070 = vmatmul.msk.bf16.vlgmr.msra.gmra.mxu2 %vm318_vm0, %v301_v5 }
  0x59   :  { %481 = vmatpush.bf16.msrb.mxu1 %v1830_v44 }
  0xd0   :  { %v331_v7 = vpop.f32.mrf.mxu0 }
  0xd1   :  { %v360_v8 = vpop.f32.mrf.mxu1  ;;  %v332_v12 = vadd.f32 %v1193_v9, %v331_v7  ;;  %v1843_v7 = vld [vmem:[#allocation13] sm:$0xff] }
  0xd2   :  { %v361_v10 = vadd.f32 %v1194_v6, %v360_v8  ;;  %v1840_v6 = vld [vmem:[#allocation13 + $0x8] sm:$0xff] }
  0xd3   :  { %v393_v16 = vpack.c.bf16 %v332_v12, %v332_v12  ;;  %553 = vmatpush.bf16.msrb.mxu2 %v1840_v6  ;;  %v1850_v8 = vld [vmem:[%s1990_s14 + $0x38] sm:$0xff] }
  0xd4   :  { %v394_v11 = vpack.c.bf16 %v361_v10, %v361_v10 }
  0xd6   :  { %v399_v13 = vsel %vm318_vm0, %v394_v11, 0  ;;  %v1857_v11 = vld [vmem:[%s1990_s14 + $0x30] sm:$0xff] }
  0xd7   :  { %408 = vmatpush.bf16.xpose.msra.mxu3 %v399_v13  ;;  %554 = vmatpush.bf16.msrb.mxu2 %v1843_v7 }
  0xd8   :  { %v333_v14 = vpop.f32.mrf.mxu0 }
  0xd9   :  { %v362_v15 = vpop.f32.mrf.mxu1 }
  0xda   :  { %v389_v28 = vpop.f32.mrf.mxu2 }
  0xdb   :  { %v390_v36 = vadd.f32 %v1195_v35, %v389_v28  ;;  %748 = vmatpush.bf16.msra.mxu2 %v1768_v0  ;;  %v1871_v28 = vld [vmem:[%s1990_s14 + $0x20] sm:$0xff] }
  0xdd   :  { %v433_v37 = vpack.c.bf16 %v390_v36, %v390_v36 }
  0xde   :  { %1071 = vmatmul.msk.bf16.vlgmr.msra.gmra.mxu3 %vm318_vm0, %v393_v16 }
  0xdf   :  { %v439_v38 = vsel %vm437_vm4, %v433_v37, 0  ;;  %622 = vmatpush.bf16.msrb.mxu3 %v1850_v8  ;;  %749 = vmatpush.bf16.msra.mxu2 %v1778_v2 }
  0xe0   :  { %448 = vmatpush.bf16.msrb.mxu0 %v439_v38 }
  0xe2   :  { %v391_v32 = vpop.f32.mrf.mxu2 }
  0xe3   :  { %623 = vmatpush.bf16.msrb.mxu3 %v1857_v11  ;;  %v1895_v32 = vld [vmem:[%s1990_s14] sm:$0xff] }
 0x161   :  { %v410_v23 = vpop.f32.mrf.mxu3 }
 0x162   :  { %v414_v24 = vmul.f32 0.17677669, %v410_v23 }
 0x164   :  { %v419_v25 = vsel %vm418_vm2, %v414_v24, -1e+09  ;;  %v1198_v24 = vld [vmem:[#allocation11] ss:$0 sm:$0xff] }
 0x165   :  { %v421_v26 = vsel %vm420_vm3, %v419_v25, -inf }
 0x166   :  { %422 = vmax.xlane.f32.xlu0 %v421_v26 }
 0x169   :  { %v412_v27 = vpop.f32.mrf.mxu3 }
 0x16a   :  { %v1865_v27 = vld [vmem:[%s1990_s14 + $0x28] sm:$0xff] }
 0x16b   :  { %624 = vmatpush.bf16.msrb.mxu3 %v1865_v27 }
 0x16f   :  { %625 = vmatpush.bf16.msrb.mxu3 %v1871_v28 }
 0x1d9   :  { %v423_v29 = vpop.xlane.xlu0 %422 }
 0x1da   :  { %v424_v30 = vsub.f32 %v419_v25, %v423_v29  ;;  %v1877_v29 = vld [vmem:[%s1990_s14 + $0x18] sm:$0xff] }
 0x1db   :  { %626 = vmatpush.bf16.msrb.mxu3 %v1877_v29 }
 0x1dc   :  { %v425_v31 = vmul.f32 1.442695, %v424_v30  ;;  %v1883_v30 = vld [vmem:[%s1990_s14 + $0x10] sm:$0xff] }
 0x1de   :  { %1213 = vpow2.f32 %v425_v31  ;;  %v1889_v31 = vld [vmem:[%s1990_s14 + $0x8] sm:$0xff] }
 0x1df   :  { %627 = vmatpush.bf16.msrb.mxu3 %v1883_v30 }
 0x1e3   :  { %628 = vmatpush.bf16.msrb.mxu3 %v1889_v31 }
 0x1e4   :  { %v1214_v33 = vpop.eup %1213 }
 0x1e5   :  { %v427_v34 = vsel %vm420_vm3, %v1214_v33, 0.0 }
 0x1e6   :  { %428 = vadd.xlane.f32.xlu0 %v427_v34 }
 0x1e7   :  { %629 = vmatpush.bf16.msrb.mxu3 %v1895_v32 }
 0x259   :  { %v429_v40 = vpop.xlane.xlu0 %428 }
 0x25a   :  { %1215 = vrcp.f32 %v429_v40 }
 0x25b   :  { %1217 = vrcp.f32 %v1609_v54 }
 0x260   :  { %v1216_v41 = vpop.eup %1215 }
 0x261   :  { %v431_v42 = vmul.f32 %v1216_v41, %v1214_v33  ;;  %v1218_v55 = vpop.eup %1217  ;;  %v1199_v33 = vld [vmem:[#allocation14] ss:$0 sm:$0xff] }
 0x262   :  { %v494_v56 = vmul.f32 32.0, %v1218_v55  ;;  %vm498_vm5 = vweird.f32 %v1218_v55 }
 0x263   :  { %v432_v43 = vpack.c.bf16 %v431_v42, %v431_v42 }
 0x264   :  { %v495_v57 = vsub.f32 1.0, %v494_v56 }
 0x265   :  { %1072 = vmatmul.msk.bf16.vlgmr.msrb.gmra.mxu0 %vm420_vm3, %v432_v43 }
 0x266   :  { %v496_v58 = vmul.f32 %v1218_v55, %v495_v57 }
 0x268   :  { %v497_v59 = vadd.f32 %v1218_v55, %v496_v58 }
 0x26a   :  { %v1836_v60 = vsel %vm498_vm5, %v1218_v55, %v497_v59 }
 0x2e2   :  { %v450_v45 = vpop.f32.mrf.mxu0 }
 0x2e3   :  { %v454_v46 = vpack.c.bf16 %v450_v45, %v450_v45 }
 0x2e5   :  { %1081 = vmatmul.msk.bf16.vlgmr.msrb.gmra.mxu1 %vm318_vm0, %v454_v46 }
 0x2ea   :  { %v452_v47 = vpop.f32.mrf.mxu0 }
 0x362   :  { %v483_v49 = vpop.f32.mrf.mxu1 }
 0x363   :  { %v484_v50 = vadd.f32 %v1196_v48, %v483_v49  ;;  %v1200_v49 = vld [vmem:[#allocation16] ss:$0 sm:$0xff] }
 0x365   :  { %v487_v51 = vadd.f32 %v484_v50, %v1790_v4 }
 0x367   :  { %v490_v52 = vsel %vm318_vm0, %v487_v51, 0.0 }
 0x368   :  { %491 = vadd.xlane.f32.xlu1 %v490_v52 }
 0x36a   :  { %v485_v53 = vpop.f32.mrf.mxu1 }
 0x3db   :  { %v492_v61 = vpop.xlane.xlu1 %491 }
 0x3dc   :  { %v500_v62 = vmul.f32 %v1836_v60, %v492_v61  ;;  %v1904_v61 = vld [vmem:[%s1994_s18 + $0x8] sm:$0xff] }
 0x3dd   :  { %691 = vmatpush.bf16.msra.mxu0 %v1904_v61 }
 0x3de   :  { %v501_v63 = vsub.f32 %v487_v51, %v500_v62  ;;  %v1910_v62 = vld [vmem:[%s1994_s18] sm:$0xff] }
 0x3e0   :  { %v502_v5 = vmul.f32 %v501_v63, %v501_v63 }
 0x3e1   :  { %692 = vmatpush.bf16.msra.mxu0 %v1910_v62 }
 0x3e2   :  { %v503_v4 = vsel %vm318_vm0, %v502_v5, 0.0 }
 0x3e3   :  { %504 = vadd.xlane.f32.xlu1 %v503_v4 }
 0x3e5   :  { %765 = vmatpush.bf16.msrb.mxu0 %v1773_v1 }
 0x3e9   :  { %766 = vmatpush.bf16.msrb.mxu0 %v1783_v3 }
 0x456   :  { %v505_v9 = vpop.xlane.xlu1 %504 }
 0x457   :  { %v506_v10 = vmul.f32 %v505_v9, %v1836_v60 }
 0x459   :  { %v507_v12 = vadd.f32 1e-12, %v506_v10 }
 0x45b   :  { %1219 = vrsqrt.f32 %v507_v12  ;;  %vm514_vm7 = vweird.f32 %v507_v12 }
 0x461   :  { %v1220_v0 = vpop.eup %1219 }
 0x462   :  { %v509_v13 = vmul.f32 %v1220_v0, %v507_v12  ;;  %vm515_vm6 = vweird.f32 %v1220_v0 }
 0x463   :  { %vm516_vm8 = vmor %vm514_vm7, %vm515_vm6 }
 0x464   :  { %v510_v14 = vmul.f32 %v1220_v0, %v509_v13 }
 0x466   :  { %v511_v15 = vmul.f32 0.5, %v510_v14 }
 0x468   :  { %v512_v16 = vsub.f32 1.5, %v511_v15 }
 0x46a   :  { %v513_v19 = vmul.f32 %v1220_v0, %v512_v16  ;;  %v1201_v16 = vld [vmem:[#allocation17] ss:$0 sm:$0xff] }
 0x46c   :  { %v517_v22 = vsel %vm516_vm8, %v1220_v0, %v513_v19 }
 0x46d   :  { %v518_v23 = vmul.f32 %v517_v22, %v501_v63  ;;  %v1917_v63 = vld [vmem:[%s2015_s10 + $0x8] sm:$0xff]  ;;  %v1202_v22 = vld [vmem:[#allocation19] ss:$0 sm:$0xff] }
 0x46e   :  { %v734_v4 = vpack.c.bf16 %v1917_v63, %v1917_v63 }
 0x46f   :  { %v522_v25 = vmul.f32 %v1197_v21, %v518_v23 }
 0x471   :  { %v526_v26 = vadd.f32 %v1198_v24, %v522_v25  ;;  %v1172_v25 = vld [vmem:[#allocation22 + $0x8] sm:$0xff] }
 0x472   :  { %722 = vmatpush.bf16.msra.mxu1 %v1172_v25 }
 0x473   :  { %v527_v2 = vpack.c.bf16 %v526_v26, %v526_v26 }
 0x475   :  { %1090 = vmatmul.msk.bf16.vlgmr.msrb.gmra.mxu2 %vm318_vm0, %v527_v2 }
 0x485   :  { %1142 = vmatmul.msk.bf16.vlgmr.msra.gmra.mxu2 %vm318_vm0, %v734_v4 }
 0x4f8   :  { %v556_v34 = vpop.f32.mrf.mxu2 }
 0x4f9   :  { %v557_v35 = vadd.f32 %v1199_v33, %v556_v34  ;;  %v669_v34 = vld [vmem:[#allocation20] sm:$0x1] }
 0x4fb   :  { %v561_v36 = vmul.f32 0.044715, %v557_v35  ;;  %v560_v45 = vmul.f32 0.5, %v557_v35 }
 0x4fd   :  { %v562_v37 = vmul.f32 %v561_v36, %v557_v35 }
 0x4ff   :  { %v563_v38 = vmul.f32 %v562_v37, %v557_v35 }
 0x500   :  { %v558_v40 = vpop.f32.mrf.mxu2 }
 0x501   :  { %v564_v41 = vadd.f32 %v563_v38, %v557_v35  ;;  %v1203_v38 = vld [vmem:[#allocation5] ss:$0 sm:$0xff] }
 0x503   :  { %v565_v42 = vmul.f32 0.7978846, %v564_v41 }
 0x505   :  { %1221 = vtanh.f32 %v565_v42 }
 0x508   :  { %v751_v2 = vpop.f32.mrf.mxu2 }
 0x50b   :  { %v1222_v43 = vpop.eup %1221 }
 0x50c   :  { %v567_v46 = vadd.f32 1.0, %v1222_v43 }
 0x50e   :  { %v568_v47 = vmul.f32 %v567_v46, %v560_v45 }
 0x510   :  { %v569_v48 = vpack.c.bf16 %v568_v47, %v568_v47  ;;  %v753_v33 = vpop.f32.mrf.mxu2  ;;  %v733_v47 = vld [vmem:[#allocation2 + $0x1] sm:$0x1] }
 0x511   :  { %vm811_vm12 = vcmp.gt.f32.partialorder %v733_v47, 0.0 }
 0x512   :  { %630 = vmatmul.bf16.vlgmr.msrb.gmra.mxu3 %v569_v48 }
 0x595   :  { %v631_v50 = vpop.f32.mrf.mxu3 }
 0x596   :  { %v632_v51 = vadd.f32 %v1200_v49, %v631_v50  ;;  %v1205_v49 = vld [vmem:[#allocation7] ss:$0 sm:$0xff] }
 0x598   :  { %v635_v52 = vadd.f32 %v632_v51, %v526_v26  ;;  %v1171_v26 = vld [vmem:[#allocation22] sm:$0xff] }
 0x599   :  { %723 = vmatpush.bf16.msra.mxu1 %v1171_v26 }
 0x59a   :  { %v638_v53 = vsel %vm318_vm0, %v635_v52, 0.0 }
 0x59b   :  { %639 = vadd.xlane.f32.xlu2 %v638_v53 }
 0x59d   :  { %v633_v54 = vpop.f32.mrf.mxu3  ;;  %782 = vmatpush.bf16.msrb.mxu1 %v1806_v17  ;;  %v1204_v17 = vld [vmem:[%s2016_s9] ss:$0 sm:$0xff] }
 0x59e   :  { %v752_v43 = vadd.f32 %v1204_v17, %v751_v2  ;;  %v1209_v17 = vld [vmem:[#allocation14] ss:$0 sm:$0xff] }
 0x5a0   :  { %v789_v46 = vpack.c.bf16 %v752_v43, %v752_v43 }
 0x5a1   :  { %783 = vmatpush.bf16.msrb.mxu1 %v1812_v18 }
 0x60e   :  { %v640_v55 = vpop.xlane.xlu2 %639 }
 0x60f   :  { %v641_v56 = vmul.f32 %v640_v55, %v1836_v60 }
 0x611   :  { %v642_v57 = vsub.f32 %v635_v52, %v641_v56 }
 0x613   :  { %v643_v58 = vmul.f32 %v642_v57, %v642_v57 }
 0x615   :  { %v644_v59 = vsel %vm318_vm0, %v643_v58, 0.0 }
 0x616   :  { %645 = vadd.xlane.f32.xlu2 %v644_v59 }
 0x689   :  { %v646_v5 = vpop.xlane.xlu2 %645 }
 0x68a   :  { %v647_v9 = vmul.f32 %v646_v5, %v1836_v60 }
 0x68c   :  { %v648_v10 = vadd.f32 1e-12, %v647_v9 }
 0x68e   :  { %1223 = vrsqrt.f32 %v648_v10  ;;  %vm655_vm10 = vweird.f32 %v648_v10 }
 0x694   :  { %v1224_v12 = vpop.eup %1223 }
 0x695   :  { %v650_v0 = vmul.f32 %v1224_v12, %v648_v10  ;;  %vm656_vm9 = vweird.f32 %v1224_v12 }
 0x696   :  { %vm657_vm11 = vmor %vm655_vm10, %vm656_vm9 }
 0x697   :  { %v651_v1 = vmul.f32 %v1224_v12, %v650_v0 }
 0x699   :  { %v652_v13 = vmul.f32 0.5, %v651_v1 }
 0x69b   :  { %v653_v14 = vsub.f32 1.5, %v652_v13 }
 0x69d   :  { %v654_v15 = vmul.f32 %v1224_v12, %v653_v14 }
 0x69f   :  { %v658_v19 = vsel %vm657_vm11, %v1224_v12, %v654_v15 }
 0x6a0   :  { %v659_v21 = vmul.f32 %v658_v19, %v642_v57 }
 0x6a2   :  { %v663_v23 = vmul.f32 %v1201_v16, %v659_v21 }
 0x6a4   :  { %v667_v24 = vadd.f32 %v1202_v22, %v663_v23 }
 0x6a6   :  { %v668_v3 = vpack.c.bf16 %v667_v24, %v667_v24 }
 0x6a8   :  { %1131 = vmatmul.msk.bf16.vlgmr.msra.gmra.mxu0 %vm318_vm0, %v668_v3 }
 0x6a9   :  { %862 = vmatpush.bf16.msra.mxu0 %v1823_v39 }
 0x6ad   :  { %863 = vmatpush.bf16.msra.mxu0 %v1830_v44 }
 0x6b8   :  { %1143 = vmatmul.msk.bf16.vlgmr.msrb.gmra.mxu0 %vm318_vm0, %v734_v4 }
 0x6b9   :  { %1013 = vmatpush.bf16.msrb.mxu0 %v1172_v25 }
 0x6bd   :  { %1014 = vmatpush.bf16.msrb.mxu0 %v1171_v26 }
 0x725   :  { %v694_v35 = vpop.f32.mrf.mxu0 }
 0x726   :  { %v695_v36 = vadd.f32 %v694_v35, %v669_v34 }
 0x728   :  { %1225 = vtanh.f32 %v695_v36  ;;  %v1207_v36 = vld [vmem:[#allocation10] ss:$0 sm:$0xff] }
 0x72d   :  { %v696_v39 = vpop.f32.mrf.mxu0 }
 0x72e   :  { %v1226_v44 = vpop.eup %1225 }
 0x72f   :  { %v699_v37 = vpack.c.bf16 %v1226_v44, %v1226_v44  ;;  %v1208_v44 = vld [vmem:[#allocation11] ss:$0 sm:$0xff] }
 0x731   :  { %1140 = vmatmul.msk.bf16.vlgmr.msra.gmra.mxu1 %vm318_vm0, %v699_v37 }
 0x732   :  { %916 = vmatpush.bf16.msra.mxu1 %v1840_v6  ;;  %v700_v6 = vld [vmem:[%s1997_s21] sm:$0x1] }
 0x735   :  { %v768_v40 = vpop.f32.mrf.mxu0 }
 0x736   :  { %v769_v41 = vadd.f32 %v1203_v38, %v768_v40  ;;  %917 = vmatpush.bf16.msra.mxu1 %v1843_v7 }
 0x738   :  { %v790_v18 = vpack.c.bf16 %v769_v41, %v769_v41 }
 0x73a   :  { %v795_v42 = vsel %vm318_vm0, %v790_v18, 0 }
 0x73b   :  { %804 = vmatpush.bf16.xpose.msrb.mxu2 %v795_v42 }
 0x73d   :  { %v770_v45 = vpop.f32.mrf.mxu0 }
 0x741   :  { %1144 = vmatmul.msk.bf16.vlgmr.msrb.gmra.mxu1 %vm318_vm0, %v734_v4 }
 0x742   :  { %1145 = vmatmul.msk.bf16.vlgmr.msrb.gmra.mxu2 %vm318_vm0, %v789_v46 }
 0x743   :  { %937 = vmatpush.bf16.msra.mxu2 %v1850_v8 }
 0x747   :  { %938 = vmatpush.bf16.msra.mxu2 %v1857_v11 }
 0x74b   :  { %939 = vmatpush.bf16.msra.mxu2 %v1865_v27  ;;  %v812_v27 = vsel %vm811_vm12, 1, %v1608_v20 }
 0x74f   :  { %940 = vmatpush.bf16.msra.mxu2 %v1871_v28  ;;  %v813_v28 = vperm.slane %v812_v27, 0 }
 0x751   :  { %vm814_vm13 = vcmp.eq.s32.totalorder %v813_v28, 1 }
 0x753   :  { %941 = vmatpush.bf16.msra.mxu2 %v1877_v29 }
 0x757   :  { %942 = vmatpush.bf16.msra.mxu2 %v1883_v30 }
 0x75b   :  { %943 = vmatpush.bf16.msra.mxu2 %v1889_v31 }
 0x75f   :  { %944 = vmatpush.bf16.msra.mxu2 %v1895_v32 }
 0x7ae   :  { %v725_v7 = vpop.f32.mrf.mxu1 }
 0x7af   :  { %v726_v8 = vadd.f32 %v725_v7, %v700_v6 }
 0x7b1   :  { %729 = vst [vmem:[#allocation23] sm:$0x1] %v726_v8 }
 0x7b6   :  { %v727_v11 = vpop.f32.mrf.mxu1 }
 0x7be   :  { %v785_v50 = vpop.f32.mrf.mxu1 }
 0x7bf   :  { %v786_v51 = vadd.f32 %v1205_v49, %v785_v50 }
 0x7c1   :  { %v828_v52 = vpack.c.bf16 %v786_v51, %v786_v51 }
 0x7c3   :  { %v833_v53 = vsel %vm437_vm4, %v828_v52, 0 }
 0x7c4   :  { %842 = vmatpush.bf16.msra.mxu3 %v833_v53 }
 0x7c5   :  { %v806_v29 = vpop.f32.mrf.mxu2 }
 0x7c6   :  { %v810_v30 = vmul.f32 0.17677669, %v806_v29  ;;  %v787_v54 = vpop.f32.mrf.mxu1 }
 0x7c8   :  { %v815_v48 = vsel %vm814_vm13, %v810_v30, -1e+09  ;;  %994 = vmatpush.bf16.msrb.mxu3 %v1904_v61  ;;  %v1210_v30 = vld [vmem:[#allocation16] ss:$0 sm:$0xff] }
 0x7c9   :  { %v816_v31 = vsel %vm420_vm3, %v815_v48, -inf }
 0x7ca   :  { %817 = vmax.xlane.f32.xlu0 %v816_v31 }
 0x7cc   :  { %995 = vmatpush.bf16.msrb.mxu3 %v1910_v62  ;;  %v1206_v62 = vld [vmem:[#allocation8] ss:$0 sm:$0xff] }
 0x7cd   :  { %v808_v32 = vpop.f32.mrf.mxu2 }
 0x83d   :  { %v818_v20 = vpop.xlane.xlu0 %817 }
 0x83e   :  { %v819_v55 = vsub.f32 %v815_v48, %v818_v20 }
 0x840   :  { %v820_v56 = vmul.f32 1.442695, %v819_v55 }
 0x842   :  { %1227 = vpow2.f32 %v820_v56 }
 0x848   :  { %v1228_v57 = vpop.eup %1227 }
 0x849   :  { %v822_v58 = vsel %vm420_vm3, %v1228_v57, 0.0 }
 0x84a   :  { %823 = vadd.xlane.f32.xlu1 %v822_v58 }
 0x8bd   :  { %v824_v59 = vpop.xlane.xlu1 %823 }
 0x8be   :  { %1229 = vrcp.f32 %v824_v59 }
 0x8c4   :  { %v1230_v5 = vpop.eup %1229 }
 0x8c5   :  { %v826_v4 = vmul.f32 %v1230_v5, %v1228_v57 }
 0x8c7   :  { %v827_v9 = vpack.c.bf16 %v826_v4, %v826_v4 }
 0x8c9   :  { %1146 = vmatmul.msk.bf16.vlgmr.msra.gmra.mxu3 %vm420_vm3, %v827_v9 }
 0x94c   :  { %v844_v10 = vpop.f32.mrf.mxu3 }
 0x94d   :  { %v848_v12 = vpack.c.bf16 %v844_v10, %v844_v10 }
 0x94f   :  { %1147 = vmatmul.msk.bf16.vlgmr.msra.gmra.mxu0 %vm318_vm0, %v848_v12  ;;  %v1211_v12 = vld [vmem:[#allocation17] ss:$0 sm:$0xff] }
 0x954   :  { %v846_v61 = vpop.f32.mrf.mxu3 }
 0x9cc   :  { %v865_v0 = vpop.f32.mrf.mxu0 }
 0x9cd   :  { %v866_v1 = vadd.f32 %v1206_v62, %v865_v0  ;;  %v1212_v0 = vld [vmem:[#allocation19] ss:$0 sm:$0xff] }
 0x9cf   :  { %v869_v13 = vadd.f32 %v1917_v63, %v866_v1 }
 0x9d1   :  { %v872_v14 = vsel %vm318_vm0, %v869_v13, 0.0 }
 0x9d2   :  { %873 = vadd.xlane.f32.xlu2 %v872_v14 }
 0x9d4   :  { %v867_v15 = vpop.f32.mrf.mxu0 }
 0xa45   :  { %v874_v16 = vpop.xlane.xlu2 %873 }
 0xa46   :  { %v875_v19 = vmul.f32 %v874_v16, %v1836_v60 }
 0xa48   :  { %v876_v21 = vsub.f32 %v869_v13, %v875_v19 }
 0xa4a   :  { %v877_v22 = vmul.f32 %v876_v21, %v876_v21 }
 0xa4c   :  { %v878_v23 = vsel %vm318_vm0, %v877_v22, 0.0 }
 0xa4d   :  { %879 = vadd.xlane.f32.xlu0 %v878_v23  ;;  %v1003_v23 = vld [vmem:[%s1997_s21] sm:$0x1] }
 0xac0   :  { %v880_v24 = vpop.xlane.xlu0 %879 }
 0xac1   :  { %v881_v3 = vmul.f32 %v880_v24, %v1836_v60 }
 0xac3   :  { %v882_v25 = vadd.f32 1e-12, %v881_v3 }
 0xac5   :  { %1231 = vrsqrt.f32 %v882_v25  ;;  %vm889_vm15 = vweird.f32 %v882_v25 }
 0xacb   :  { %v1232_v26 = vpop.eup %1231 }
 0xacc   :  { %v884_v2 = vmul.f32 %v1232_v26, %v882_v25  ;;  %vm890_vm14 = vweird.f32 %v1232_v26 }
 0xacd   :  { %vm891_vm1 = vmor %vm889_vm15, %vm890_vm14 }
 0xace   :  { %v885_v63 = vmul.f32 %v1232_v26, %v884_v2 }
 0xad0   :  { %v886_v33 = vmul.f32 0.5, %v885_v63 }
 0xad2   :  { %v887_v34 = vsub.f32 1.5, %v886_v33 }
 0xad4   :  { %v888_v35 = vmul.f32 %v1232_v26, %v887_v34 }
 0xad6   :  { %v892_v39 = vsel %vm891_vm1, %v1232_v26, %v888_v35 }
 0xad7   :  { %v893_v37 = vmul.f32 %v892_v39, %v876_v21 }
 0xad9   :  { %v897_v38 = vmul.f32 %v1207_v36, %v893_v37 }
 0xadb   :  { %v901_v40 = vadd.f32 %v1208_v44, %v897_v38 }
 0xadd   :  { %v902_v41 = vpack.c.bf16 %v901_v40, %v901_v40 }
 0xadf   :  { %1148 = vmatmul.msk.bf16.vlgmr.msra.gmra.mxu1 %vm318_vm0, %v902_v41 }
 0xb5c   :  { %v919_v18 = vpop.f32.mrf.mxu1 }
 0xb5d   :  { %v920_v42 = vadd.f32 %v1209_v17, %v919_v18 }
 0xb5f   :  { %v924_v43 = vmul.f32 0.044715, %v920_v42  ;;  %v923_v47 = vmul.f32 0.5, %v920_v42 }
 0xb61   :  { %v925_v45 = vmul.f32 %v924_v43, %v920_v42 }
 0xb63   :  { %v926_v46 = vmul.f32 %v925_v45, %v920_v42 }
 0xb64   :  { %v921_v6 = vpop.f32.mrf.mxu1 }
 0xb65   :  { %v927_v7 = vadd.f32 %v926_v46, %v920_v42 }
 0xb67   :  { %v928_v8 = vmul.f32 0.7978846, %v927_v7 }
 0xb69   :  { %1233 = vtanh.f32 %v928_v8 }
 0xb6f   :  { %v1234_v11 = vpop.eup %1233 }
 0xb70   :  { %v930_v27 = vadd.f32 1.0, %v1234_v11 }
 0xb72   :  { %v931_v28 = vmul.f32 %v930_v27, %v923_v47 }
 0xb74   :  { %v932_v29 = vpack.c.bf16 %v931_v28, %v931_v28 }
 0xb76   :  { %945 = vmatmul.bf16.vlgmr.msra.gmra.mxu2 %v932_v29 }
 0xbf9   :  { %v946_v48 = vpop.f32.mrf.mxu2 }
 0xbfa   :  { %v947_v31 = vadd.f32 %v1210_v30, %v946_v48 }
 0xbfc   :  { %v950_v32 = vadd.f32 %v947_v31, %v901_v40 }
 0xbfe   :  { %v953_v49 = vsel %vm318_vm0, %v950_v32, 0.0 }
 0xbff   :  { %954 = vadd.xlane.f32.xlu1 %v953_v49 }
 0xc01   :  { %v948_v50 = vpop.f32.mrf.mxu2 }
 0xc72   :  { %v955_v51 = vpop.xlane.xlu1 %954 }
 0xc73   :  { %v956_v52 = vmul.f32 %v955_v51, %v1836_v60 }
 0xc75   :  { %v957_v53 = vsub.f32 %v950_v32, %v956_v52 }
 0xc77   :  { %v958_v54 = vmul.f32 %v957_v53, %v957_v53 }
 0xc79   :  { %v959_v20 = vsel %vm318_vm0, %v958_v54, 0.0 }
 0xc7a   :  { %960 = vadd.xlane.f32.xlu2 %v959_v20 }
 0xced   :  { %v961_v55 = vpop.xlane.xlu2 %960 }
 0xcee   :  { %v962_v56 = vmul.f32 %v961_v55, %v1836_v60  ;;  %v984_v60 = vld [vmem:[#allocation20] sm:$0x1] }
 0xcf0   :  { %v963_v57 = vadd.f32 1e-12, %v962_v56 }
 0xcf2   :  { %1235 = vrsqrt.f32 %v963_v57  ;;  %vm970_vm3 = vweird.f32 %v963_v57 }
 0xcf8   :  { %v1236_v58 = vpop.eup %1235 }
 0xcf9   :  { %v965_v59 = vmul.f32 %v1236_v58, %v963_v57  ;;  %vm971_vm2 = vweird.f32 %v1236_v58 }
 0xcfa   :  { %vm972_vm4 = vmor %vm970_vm3, %vm971_vm2 }
 0xcfb   :  { %v966_v5 = vmul.f32 %v1236_v58, %v965_v59 }
 0xcfd   :  { %v967_v4 = vmul.f32 0.5, %v966_v5 }
 0xcff   :  { %v968_v9 = vsub.f32 1.5, %v967_v4 }
 0xd01   :  { %v969_v10 = vmul.f32 %v1236_v58, %v968_v9 }
 0xd03   :  { %v973_v61 = vsel %vm972_vm4, %v1236_v58, %v969_v10 }
 0xd04   :  { %v974_v62 = vmul.f32 %v973_v61, %v957_v53 }
 0xd06   :  { %v978_v1 = vmul.f32 %v1211_v12, %v974_v62 }
 0xd08   :  { %v982_v13 = vadd.f32 %v1212_v0, %v978_v1 }
 0xd0a   :  { %v983_v14 = vpack.c.bf16 %v982_v13, %v982_v13 }
 0xd0c   :  { %1149 = vmatmul.msk.bf16.vlgmr.msrb.gmra.mxu3 %vm318_vm0, %v983_v14 }
 0xd8f   :  { %v997_v15 = vpop.f32.mrf.mxu3 }
 0xd90   :  { %v998_v16 = vadd.f32 %v997_v15, %v984_v60 }
 0xd92   :  { %1237 = vtanh.f32 %v998_v16 }
 0xd97   :  { %v999_v19 = vpop.f32.mrf.mxu3 }
 0xd98   :  { %v1238_v21 = vpop.eup %1237 }
 0xd99   :  { %v1002_v22 = vpack.c.bf16 %v1238_v21, %v1238_v21 }
 0xd9b   :  { %1150 = vmatmul.msk.bf16.vlgmr.msrb.gmra.mxu0 %vm318_vm0, %v1002_v22 }
 0xe18   :  { %v1016_v24 = vpop.f32.mrf.mxu0 }
 0xe19   :  { %v1017_v3 = vadd.f32 %v1016_v24, %v1003_v23 }
 0xe1b   :  { %1020 = vst [vmem:[#allocation23 + $0x1] sm:$0x1] %v1017_v3 }
 0xe1c   :  { %1031 = dma.vmem_to_hbm [thread:$0]  %s1027_s8, 32, %s1029_s20, [#allocation4]  }
 0xe20   :  { %v1018_v25 = vpop.f32.mrf.mxu0 }
 0xe21   :  { %1589 = dma.done.wait [#allocation4], 32  }
 0xe22   :  { %1590 = vsyncadd [#allocation4], 4294967264 }
 0xe23   :  { %1036 = vsyncpa [#allocation3], 1 }
 0xe24   :  { %1037 = vsyncpa [#allocation6], 1 }
 0xe25   :  { %1038 = vsyncpa [#allocation9], 1 }
 0xe26   :  { %1039 = vsyncpa [#allocation12], 1 }
 0xe27   :  { %1040 = vsyncpa [#allocation15], 1 }
 0xe28   :  { %1041 = vsyncpa [#allocation18], 1 }
 0xe29   :  { %1042 = vsyncpa [#allocation21], 1 }
 0xe2a   :  { %1043 = vsyncpa [#allocation4], 1 }

</bundles_post_ra>
